<compile_context>
chip_gen: v7x
topology: tpu7x:2x2x1
jax: 0.10.0
libtpu: 0.0.40
codegen_flags: <defaults>
</compile_context>

<pallas_src>
import math
import jax
import jax.numpy as jnp
from jax.experimental import pallas as pl
from jax.experimental.pallas import tpu as pltpu


# ----------------------------- Pallas kernel -----------------------------

def additive_attn_kernel(qk_ref, v_ref, w_ref, bias_ref, o_ref):
    # qk_ref   : (2C, HW)  -- [q-channels ; k-channels] for one batch
    # v_ref    : (C,  HW)
    # w_ref    : (C,  2C)  -- block-diagonal fused conv1x1 weight
    # bias_ref : (C,  HW)  -- (Wq+Wk) @ pe, tiled over heads
    # o_ref    : (C,  HW)
    s = jnp.dot(w_ref[...], qk_ref[...],
                preferred_element_type=jnp.float32) + bias_ref[...]
    o_ref[...] = (jax.nn.sigmoid(s) * v_ref[...]).astype(o_ref.dtype)


def additive_attention_pallas(q, k, v, w, pe, num_heads):
    """q,k,v: (B, C, H, W) f32. w: (d_k, 2*d_k) conv1x1 weight. pe: (d_k, H, W)."""
    B, C, H, W = q.shape
    d_k = C // num_heads
    HW = H * W

    # --- wrapper-side glue (plain JAX; XLA fuses these cheap preps) ---
    wq = w[:, :d_k]                        # (d_k, d_k)
    wk = w[:, d_k:]                        # (d_k, d_k)
    eye = jnp.eye(num_heads, dtype=w.dtype)
    wq_bd = jnp.kron(eye, wq)              # (C, C) block-diagonal
    wk_bd = jnp.kron(eye, wk)              # (C, C) block-diagonal
    w_cat = jnp.concatenate([wq_bd, wk_bd], axis=1)        # (C, 2C)

    pef = pe.reshape(d_k, HW)
    # bias per head = (Wq + Wk) @ pe  -> identical across heads, tile on sublanes
    bias = jnp.tile(jnp.dot(wq + wk, pef), (num_heads, 1))  # (C, HW)

    qf = q.reshape(B, C, HW)
    kf = k.reshape(B, C, HW)
    vf = v.reshape(B, C, HW)
    qkf = jnp.concatenate([qf, kf], axis=1)                 # (B, 2C, HW)

    qk_spec = pl.BlockSpec((None, 2 * C, HW), lambda b: (b, 0, 0))
    v_spec = pl.BlockSpec((None, C, HW), lambda b: (b, 0, 0))
    w_spec = pl.BlockSpec((C, 2 * C), lambda b: (0, 0))
    bias_spec = pl.BlockSpec((C, HW), lambda b: (0, 0))
    out_spec = pl.BlockSpec((None, C, HW), lambda b: (b, 0, 0))

    out = pl.pallas_call(
        additive_attn_kernel,
        out_shape=jax.ShapeDtypeStruct((B, C, HW), q.dtype),
        grid_spec=pltpu.PrefetchScalarGridSpec(
            num_scalar_prefetch=0,
            grid=(B,),
            in_specs=[qk_spec, v_spec, w_spec, bias_spec],
            out_specs=out_spec,
        ),
        compiler_params=pltpu.CompilerParams(
            dimension_semantics=("parallel",)),
    )(qkf, vf, w_cat, bias)

    return out.reshape(B, C, H, W)


# ------------------------ deterministic parameters ------------------------

def make_conv1x1_weight(key, d_k):
    # PyTorch Conv2d default init: U(-1/sqrt(fan_in), 1/sqrt(fan_in)), fan_in = 2*d_k
    bound = 1.0 / math.sqrt(2 * d_k)
    return jax.random.uniform(key, (d_k, 2 * d_k), dtype=jnp.float32,
                              minval=-bound, maxval=bound)


def make_pos_enc(d_k, H, W):
    # Deterministic 2D sinusoidal PE, shape (d_k, H, W).
    # First half of channels encodes rows (y), second half encodes cols (x).
    half = d_k // 2

    def enc_1d(n_pos, n_ch):
        pos = jnp.arange(n_pos, dtype=jnp.float32)[:, None]       # (n_pos, 1)
        i = jnp.arange(n_ch, dtype=jnp.float32)[None, :]          # (1, n_ch)
        denom = jnp.power(10000.0, (2.0 * jnp.floor(i / 2.0)) / max(n_ch, 1))
        ang = pos / denom
        even = (jnp.arange(n_ch) % 2) == 0
        return jnp.where(even[None, :], jnp.sin(ang), jnp.cos(ang))  # (n_pos, n_ch)

    pe_y = enc_1d(H, half).T                   # (half, H)
    pe_x = enc_1d(W, d_k - half).T             # (d_k-half, W)
    pe = jnp.concatenate([
        jnp.broadcast_to(pe_y[:, :, None], (half, H, W)),
        jnp.broadcast_to(pe_x[:, None, :], (d_k - half, H, W)),
    ], axis=0)
    return pe.astype(jnp.float32)


# ------------------------------- reference -------------------------------

def additive_attention_ref(q, k, v, w, pe, num_heads):
    # Faithful to the original op order: Wq@(q+pe) + Wk@(k+pe), per head.
    B, C, H, W = q.shape
    d_k = C // num_heads
    BH = B * num_heads
    qf = q.reshape(BH, d_k, H * W) + pe.reshape(1, d_k, H * W)
    kf = k.reshape(BH, d_k, H * W) + pe.reshape(1, d_k, H * W)
    vf = v.reshape(BH, d_k, H * W)
    s = jnp.einsum('oc,bcp->bop', w[:, :d_k], qf) + \
        jnp.einsum('oc,bcp->bop', w[:, d_k:], kf)
    out = jax.nn.sigmoid(s) * vf
    return out.reshape(B, C, H, W)


# --------------------------------- main -----------------------------------

if __name__ == "__main__":
    B, C, H, W = 2, 8, 16, 16
    num_heads = 2
    d_k = C // num_heads

    key = jax.random.PRNGKey(0)
    kq, kk, kv, kw = jax.random.split(key, 4)
    q = jax.random.normal(kq, (B, C, H, W), dtype=jnp.float32)
    k = jax.random.normal(kk, (B, C, H, W), dtype=jnp.float32)
    v = jax.random.normal(kv, (B, C, H, W), dtype=jnp.float32)

    w = make_conv1x1_weight(kw, d_k)       # (d_k, 2*d_k), no bias
    pe = make_pos_enc(d_k, H, W)           # (d_k, H, W)

    out = additive_attention_pallas(q, k, v, w, pe, num_heads)
    out = jax.block_until_ready(out)

    ref = additive_attention_ref(q, k, v, w, pe, num_heads)
    assert out.shape == (B, C, H, W)
    assert jnp.allclose(out, ref, atol=1e-5, rtol=1e-5), "mismatch vs reference"

    print("KERNEL_OK")
</pallas_src>

<mosaic_0001>
module attributes {stable_mosaic.version = 11 : i64} {
  func.func @additive_attn_kernel(%arg0: i32, %arg1: memref<1x16x256xf32, #tpu.memory_space<vmem>>, %arg2: memref<1x8x256xf32, #tpu.memory_space<vmem>>, %arg3: memref<8x16xf32, #tpu.memory_space<vmem>>, %arg4: memref<8x256xf32, #tpu.memory_space<vmem>>, %arg5: memref<1x8x256xf32, #tpu.memory_space<vmem>>) attributes {dimension_semantics = [#tpu.dimension_semantics<parallel>], iteration_bounds = array<i64: 2>, scalar_prefetch = 0 : i64, scratch_operands = 0 : i64, tpu.core_type = #tpu.core_type<tc>, window_params = [{transform_indices = @transform_0, window_bounds = array<i64: 1, 16, 256>}, {transform_indices = @transform_1, window_bounds = array<i64: 1, 8, 256>}, {pipeline_mode = #tpu.pipeline_mode<synchronous>, transform_indices = @transform_2, window_bounds = array<i64: 8, 16>}, {pipeline_mode = #tpu.pipeline_mode<synchronous>, transform_indices = @transform_3, window_bounds = array<i64: 8, 256>}, {transform_indices = @transform_4, window_bounds = array<i64: 1, 8, 256>}]} {
    %c0 = arith.constant 0 : index
    %c0_0 = arith.constant 0 : index
    %0 = vector.load %arg3[%c0, %c0_0] : memref<8x16xf32, #tpu.memory_space<vmem>>, vector<8x16xf32>
    %c0_1 = arith.constant 0 : index
    %c0_2 = arith.constant 0 : index
    %c0_3 = arith.constant 0 : index
    %1 = vector.load %arg1[%c0_1, %c0_2, %c0_3] : memref<1x16x256xf32, #tpu.memory_space<vmem>>, vector<1x16x256xf32>
    %2 = vector.shape_cast %1 : vector<1x16x256xf32> to vector<16x256xf32>
    %cst = arith.constant dense<0.000000e+00> : vector<8x256xf32>
    %3 = tpu.matmul %0, %2, %cst {dimension_numbers = #tpu.dot_dimension_numbers<[1], [0], [0], [1], [0, 0, 1, 1], [], []>} : vector<8x16xf32>, vector<16x256xf32>, vector<8x256xf32> -> vector<8x256xf32>
    %c0_4 = arith.constant 0 : index
    %c0_5 = arith.constant 0 : index
    %4 = vector.load %arg4[%c0_4, %c0_5] : memref<8x256xf32, #tpu.memory_space<vmem>>, vector<8x256xf32>
    %5 = arith.addf %3, %4 : vector<8x256xf32>
    %6 = arith.negf %5 : vector<8x256xf32>
    %7 = math.exp %6 : vector<8x256xf32>
    %cst_6 = arith.constant 1.000000e+00 : f32
    %8 = vector.broadcast %cst_6 : f32 to vector<8x256xf32>
    %9 = arith.addf %8, %7 : vector<8x256xf32>
    %10 = arith.divf %8, %9 : vector<8x256xf32>
    %c0_7 = arith.constant 0 : index
    %c0_8 = arith.constant 0 : index
    %c0_9 = arith.constant 0 : index
    %11 = vector.load %arg2[%c0_7, %c0_8, %c0_9] : memref<1x8x256xf32, #tpu.memory_space<vmem>>, vector<1x8x256xf32>
    %12 = vector.shape_cast %11 : vector<1x8x256xf32> to vector<8x256xf32>
    %13 = arith.mulf %10, %12 : vector<8x256xf32>
    %c0_10 = arith.constant 0 : index
    %c0_11 = arith.constant 0 : index
    %c0_12 = arith.constant 0 : index
    %14 = vector.load %arg5[%c0_10, %c0_11, %c0_12] : memref<1x8x256xf32, #tpu.memory_space<vmem>>, vector<1x8x256xf32>
    %15 = vector.shape_cast %14 : vector<1x8x256xf32> to vector<8x256xf32>
    %16 = vector.shape_cast %13 : vector<8x256xf32> to vector<1x8x256xf32>
    tpu.vector_store %arg5[%c0_10, %c0_11, %c0_12], %16 {strides = array<i32>} : memref<1x8x256xf32, #tpu.memory_space<vmem>>, vector<1x8x256xf32>,
    return
  }
  func.func @transform_0(%arg0: i32) -> (i32, i32, i32) {
    %c0_i32 = arith.constant 0 : i32
    %c0_i32_0 = arith.constant 0 : i32
    %c0_i32_1 = arith.constant 0 : i32
    return %arg0, %c0_i32, %c0_i32_0 : i32, i32, i32
  }
  func.func @transform_1(%arg0: i32) -> (i32, i32, i32) {
    %c0_i32 = arith.constant 0 : i32
    %c0_i32_0 = arith.constant 0 : i32
    %c0_i32_1 = arith.constant 0 : i32
    return %arg0, %c0_i32, %c0_i32_0 : i32, i32, i32
  }
  func.func @transform_2(%arg0: i32) -> (i32, i32) {
    %c0_i32 = arith.constant 0 : i32
    %c0_i32_0 = arith.constant 0 : i32
    %c0_i32_1 = arith.constant 0 : i32
    return %c0_i32, %c0_i32_0 : i32, i32
  }
  func.func @transform_3(%arg0: i32) -> (i32, i32) {
    %c0_i32 = arith.constant 0 : i32
    %c0_i32_0 = arith.constant 0 : i32
    %c0_i32_1 = arith.constant 0 : i32
    return %c0_i32, %c0_i32_0 : i32, i32
  }
  func.func @transform_4(%arg0: i32) -> (i32, i32, i32) {
    %c0_i32 = arith.constant 0 : i32
    %c0_i32_0 = arith.constant 0 : i32
    %c0_i32_1 = arith.constant 0 : i32
    return %arg0, %c0_i32, %c0_i32_0 : i32, i32, i32
  }
}

</mosaic_0001>

<bundles_post_ra>
// kernel: tpu_custom_call.1
= control target key start
LH: loop header
LB: loop body
LE: loop exit
PB: predicated region body
PF: predicated region fallthrough
CT: control target
= control target key end

     0   :  { %s1129_s0 = inlined_call_operand.hbm [shape: f32[2,16,256], index: 0, kind: input, shape index: {}]   ;;  %s1130_s1 = inlined_call_operand.hbm [shape: f32[2,8,256], index: 1, kind: input, shape index: {}]   ;;  %s1131_s2 = inlined_call_operand.hbm [shape: f32[8,16], index: 2, kind: input, shape index: {}]   ;;  %s1132_s3 = inlined_call_operand.hbm [shape: f32[8,256], index: 3, kind: input, shape index: {}]   ;;  %s1133_s4 = inlined_call_operand.hbm [shape: f32[2,8,256], index: 4, kind: output, shape index: {}]  }
   0x1   :  { %1139 = sst [smem:[#allocation16_spill]] %s1129_s0 }
   0x2   :  { %1140 = sst [smem:[#allocation17_spill]] %s1131_s2 }
   0x3   :  { %9 = vsyncpa [#allocation3], 0 }
   0x4   :  { %11 = vsyncpa [#allocation3 + $0x1], 0 }
   0x5   :  { %12 = vsyncpa [#allocation6], 0 }
   0x6   :  { %14 = vsyncpa [#allocation6 + $0x1], 0 }
   0x7   :  { %15 = vsyncpa [#allocation9], 0 }
   0x8   :  { %16 = vsyncpa [#allocation4], 0 }
   0x9   :  { %18 = vsyncpa [#allocation4 + $0x1], 0  ;;  %s850_s15 = smov 0   ;;  %s852_s16 = smov 0  }
   0xa   :  { %s854_s17 = smov 0   ;;  %s856_s18 = smov 0  }
   0xb LB: > { %s871_s19 = sadd.s32 4294967295, %s815_s18   ;;  %s506_s20 = sadd.s32 4294967294, %s815_s18   ;;  %s815_s18 = sphi %s856_s18, %s1164_s18   ;;  %s811_s17 = sphi %s854_s17, %s1163_s17   ;;  %s807_s16 = sphi %s852_s16, %s1162_s16   ;;  %s803_s15 = sphi %s850_s15, %s1161_s15  }
   0xc   : > { %s875_s21 = sadd.s32 1, %s815_s18   ;;  %s31_s22 = sadd.s32 1, %s811_s17 }
   0xd   : > { %s28_s23 = ssub.s32 %s815_s18, %s875_s21  ;;  %p38_p0 = scmp.ne.s32.totalorder %s811_s17, %s807_s16 }
   0xe   : > { %p29_p1 = scmp.eq.s32.totalorder %s28_s23, 0  ;;  %p39_p2 = scmp.eq.s32.totalorder %s815_s18, 0 }
   0xf   : > { %p44_p3 = scmp.ne.s32.totalorder %s807_s16, %s803_s15  ;;  %p1134_p4 = scmp.eq.s32.totalorder %s871_s19, 0 }
  0x10   : > { %s887_s24 = scalar_select %p29_p1, %s811_s17, %s31_s22  }
  0x11   : > { %p889_p5 = por %p39_p2, %p38_p0  ;;  %p895_p6 = por %p1134_p4, %p44_p3 }
  0x12   : > { %p136_p7 = scmp.eq.s32.totalorder %s871_s19, 1  ;;  %p142_p8 = scmp.eq.s32.totalorder %s506_s20, 1 }
  0x13   : > { %s1142_s26 = scalar_select %p895_p6, 1, 0 }
  0x14   : > { %p507_p9 = scmp.ge.s32.totalorder %s815_s18, 1  ;;  %p149_p10 = scmp.lt.s32.totalorder %s815_s18, 3 }
  0x15   : > { %p902_p11 = por %p136_p7, %p38_p0  ;;  %p906_p12 = por %p142_p8, %p44_p3 }
  0x16   : > { %p910_p13 = pnand %p507_p9, %p149_p10  ;;  %s817_s30 = smov [#allocation7]  }
  0x17   : > { %s1143_s27 = scalar_select %p902_p11, 1, 0 }
  0x18   : > { %s1144_s28 = scalar_select %p906_p12, 1, 0 }
  0x19   : > { %s1145_s29 = scalar_select %p910_p13, 1, 0 }
  0x1a   : > { %p552_p2 = pneg %p910_p13  ;;  %s162_s5 = sshll.u32 %s817_s30, 4  ;;  %s163_s5 = int_to_ptr.vmem [resolvable:$true] %s162_s5 }
  0x1b   : > { %p572_p4 = scmp.lt.s32.totalorder %s815_s18, 2  ;;  %p1146_p0 = scmp.eq.s32.totalorder %s871_s19, 0 }
  0x1c   : > { %s818_s8 = smov [#allocation8]   ;;  %s1149_s2 = sld [smem:[#allocation17_spill]] }
  0x1d   : > { %p920_p7 = pnand %p552_p2, %p1146_p0  ;;  %p926_p3 = pnand %p572_p4, %p889_p5 }
  0x1e   : > { %s173_s9 = sshll.u32 %s818_s8, 4  ;;  %s930_s9 = int_to_ptr.vmem [resolvable:$true] %s173_s9 }
  0x1f   : > { %s1148_s7 = scalar_select %p926_p3, 1, 0 }
  0x20   : > { %p623_p9 = pneg %p920_p7 }
  0x22   : > { %s621_s12 = scalar_lea.hbm %s1149_s2, 128 }
  0x23   : > { %p622_p8 = scmp.ne.s32.totalorder %s1149_s2, %s621_s12  ;;  %p628_p10 = scmp.lt.u32.totalorder %s621_s12, %s1149_s2 }
  0x25   : > { %p624_p4 = pnand %p623_p9, %p622_p8 }
  0x27   : > { %p625_p5 = pneg %p624_p4 }
  0x29   : > { %p630_p2 = pnand %p628_p10, %p625_p5 }
  0x2b   : > { %633 = shalt.err (!%p630_p2)
}
  0x2c   : > { %s634_s23 = scalar_lea.vmem %s163_s5, 128  ;;  %p642_p11 = scmp.lt.s32.totalorder %s163_s5, %s163_s5 }
  0x2d   : > { %p635_p0 = scmp.ne.s32.totalorder %s163_s5, %s634_s23  ;;  %p643_p6 = scmp.lt.s32.totalorder %s634_s23, %s634_s23 }
  0x2f   : > { %p637_p1 = pnand %p635_p0, %p623_p9  ;;  %p644_p13 = por %p643_p6, %p642_p11 }
  0x31   : > { %p638_p12 = pneg %p637_p1 }
  0x33   : > { %p645_p3 = pnand %p644_p13, %p638_p12 }
  0x35   : > { %648 = shalt.err (!%p645_p3)
}
  0x36   : > { %555 = dma.hbm_to_vmem [thread:$0]  (!%p920_p7), %s1149_s2, 128, %s163_s5, [#allocation6]  }
  0x37   : > { %s955_s8 = sand.u32 1, %s811_s17   ;;  %s649_s12 = scalar_lea.hbm %s1132_s3, 256 }
  0x38   : > { %p650_p6 = scmp.ne.s32.totalorder %s1132_s3, %s649_s12  ;;  %p656_p13 = scmp.lt.u32.totalorder %s649_s12, %s1132_s3 }
  0x3a   : > { %p652_p11 = pnand %p650_p6, %p623_p9 }
  0x3c   : > { %p653_p12 = pneg %p652_p11 }
  0x3e   : > { %p658_p1 = pnand %p656_p13, %p653_p12 }
  0x40   : > { %661 = shalt.err (!%p658_p1)
}
  0x41   : > { %s662_s5 = scalar_lea.vmem %s930_s9, 256  ;;  %p670_p5 = scmp.lt.s32.totalorder %s930_s9, %s930_s9 }
  0x42   : > { %p663_p3 = scmp.ne.s32.totalorder %s930_s9, %s662_s5  ;;  %p671_p10 = scmp.lt.s32.totalorder %s662_s5, %s662_s5 }
  0x44   : > { %p665_p8 = pnand %p663_p3, %p623_p9  ;;  %p672_p2 = por %p671_p10, %p670_p5 }
  0x46   : > { %p666_p4 = pneg %p665_p8 }
  0x48   : > { %p673_p0 = pnand %p672_p2, %p666_p4 }
  0x4a   : > { %676 = shalt.err (!%p673_p0)
}
  0x4b   : > { %558 = dma.hbm_to_vmem [thread:$0]  (!%p920_p7), %s1132_s3, 256, %s930_s9, [#allocation9]  }
  0x4c   : > { %s511_s30 = sshll.u32 %s955_s8, 5  ;;  %s531_s10 = sshll.u32 %s815_s18, 9 }
  0x4d   : > { %s1150_s0 = sld [smem:[#allocation16_spill]]  ;;  %s188_s6 = scalar_lea.vmem [#allocation2], %s511_s30 }
  0x4e   : > { %s195_s14 = sshll.u32 %s188_s6, 4  ;;  %s205_s20 = sand.u32 1, %s815_s18   ;;  %s989_s14 = int_to_ptr.vmem [resolvable:$true] %s195_s14 }
  0x4f   : > { %s185_s22 = scalar_lea.sflag [#allocation3], %s955_s8  ;;  %p1151_p7 = scmp.ne.s32.totalorder %s1148_s7, 0 }
  0x51   : > { %p679_p6 = pneg %p1151_p7 }
  0x53   : > { %s987_s13 = scalar_lea.hbm %s1150_s0, %s531_s10  ;;  %s682_s25 = scalar_lea.hbm %s1150_s0, 1024 }
  0x54   : > { %s677_s5 = scalar_lea.hbm %s987_s13, 512  ;;  %p683_p13 = scmp.lt.u32.totalorder %s987_s13, %s1150_s0 }
  0x55   : > { %p678_p9 = scmp.ne.s32.totalorder %s987_s13, %s677_s5  ;;  %p684_p1 = scmp.lt.u32.totalorder %s682_s25, %s677_s5 }
  0x56   : > { %p686_p8 = scmp.lt.u32.totalorder %s677_s5, %s987_s13 }
  0x57   : > { %p680_p11 = pnand %p679_p6, %p678_p9  ;;  %p685_p3 = por %p684_p1, %p683_p13 }
  0x59   : > { %p681_p12 = pneg %p680_p11  ;;  %p687_p4 = por %p686_p8, %p685_p3 }
  0x5b   : > { %p688_p5 = pnand %p687_p4, %p681_p12 }
  0x5d   : > { %691 = shalt.err (!%p688_p5)
}
  0x5e   : > { %s692_s30 = scalar_lea.vmem %s989_s14, 512  ;;  %s819_s12 = smov [#allocation2]  }
  0x5f   : > { %p693_p10 = scmp.ne.s32.totalorder %s989_s14, %s692_s30  ;;  %s697_s6 = sshll.u32 %s819_s12, 4  ;;  %s698_s6 = int_to_ptr.vmem [resolvable:$false] %s697_s6 }
  0x60   : > { %s699_s9 = scalar_lea.vmem %s698_s6, 1024  ;;  %p700_p9 = scmp.lt.s32.totalorder %s989_s14, %s698_s6 }
  0x61   : > { %p695_p2 = pnand %p693_p10, %p679_p6  ;;  %p701_p11 = scmp.lt.s32.totalorder %s699_s9, %s692_s30 }
  0x63   : > { %p696_p0 = pneg %p695_p2  ;;  %p702_p13 = por %p701_p11, %p700_p9 }
  0x65   : > { %p703_p1 = pnand %p702_p13, %p696_p0 }
  0x67   : > { %706 = shalt.err (!%p703_p1)
}
  0x68   : > { %s820_s5 = smov 256   ;;  %s821_s23 = smov 16  }
  0x69   : > { %562 = dma.hbm_to_vmem [thread:$0]  (!%p1151_p7), %s987_s13, 512, %s989_s14, %s185_s22, %s820_s5, %s820_s5, %s821_s23  }
  0x6a   : > { %s514_s25 = sshll.u32 %s955_s8, 4  ;;  %s532_s10 = sshll.u32 %s815_s18, 8 }
  0x6b   : > { %s1025_s12 = scalar_lea.hbm %s1130_s1, %s532_s10  ;;  %s209_s6 = scalar_lea.vmem [#allocation5], %s514_s25 }
  0x6c   : > { %s217_s9 = sshll.u32 %s209_s6, 4  ;;  %s206_s0 = scalar_lea.sflag [#allocation6], %s205_s20  ;;  %s218_s9 = int_to_ptr.vmem [resolvable:$true] %s217_s9 }
  0x6d   : > { %s707_s2 = scalar_lea.hbm %s1025_s12, 256  ;;  %s712_s14 = scalar_lea.hbm %s1130_s1, 512 }
  0x6e   : > { %p708_p12 = scmp.ne.s32.totalorder %s1025_s12, %s707_s2  ;;  %p713_p4 = scmp.lt.u32.totalorder %s1025_s12, %s1130_s1 }
  0x6f   : > { %p714_p5 = scmp.lt.u32.totalorder %s712_s14, %s707_s2  ;;  %p716_p2 = scmp.lt.u32.totalorder %s707_s2, %s1025_s12 }
  0x70   : > { %p710_p3 = pnand %p708_p12, %p679_p6 }
  0x71   : > { %p715_p10 = por %p714_p5, %p713_p4 }
  0x72   : > { %p711_p8 = pneg %p710_p3 }
  0x73   : > { %p717_p0 = por %p716_p2, %p715_p10 }
  0x75   : > { %p718_p9 = pnand %p717_p0, %p711_p8 }
  0x77   : > { %721 = shalt.err (!%p718_p9)
}
  0x78   : > { %s722_s20 = scalar_lea.vmem %s218_s9, 256  ;;  %s822_s23 = smov [#allocation5]  }
  0x79   : > { %p723_p11 = scmp.ne.s32.totalorder %s218_s9, %s722_s20  ;;  %s727_s25 = sshll.u32 %s822_s23, 4  ;;  %s728_s25 = int_to_ptr.vmem [resolvable:$false] %s727_s25 }
  0x7a   : > { %s729_s10 = scalar_lea.vmem %s728_s25, 512  ;;  %p730_p12 = scmp.lt.s32.totalorder %s218_s9, %s728_s25 }
  0x7b   : > { %p725_p13 = pnand %p723_p11, %p679_p6  ;;  %p731_p3 = scmp.lt.s32.totalorder %s729_s10, %s722_s20 }
  0x7d   : > { %p726_p1 = pneg %p725_p13  ;;  %p732_p4 = por %p731_p3, %p730_p12 }
  0x7f   : > { %p733_p5 = pnand %p732_p4, %p726_p1 }
  0x81   : > { %736 = shalt.err (!%p733_p5)
}
  0x82   : > { %565 = dma.hbm_to_vmem [thread:$0]  (!%p1151_p7), %s1025_s12, 256, %s218_s9, %s206_s0  }
  0x83   : > { %p1152_p8 = scmp.ne.s32.totalorder %s1145_s29, 0 }
  0x84   : > { %s1051_s2 = sand.u32 (!%p1152_p8), 1, %s807_s16   ;;  %p1153_p6 = scmp.ne.s32.totalorder (!%p1152_p8), %s1142_s26, 0 }
  0x85   : > { %226 = sbr.rel (%p1152_p8) target bundleno = 414 (0x19e), region = 36  ;;  %s518_s11 = sshll.u32 (!%p1152_p8), %s1051_s2, 5 }
  0x86   : > { %s229_s30 = scalar_lea.sflag (!%p1152_p8), [#allocation3], %s1051_s2  ;;  %s232_s6 = scalar_lea.vmem (!%p1152_p8), [#allocation2], %s518_s11 }
  0x8c   : > { %782 = dma.done.wait (%p1153_p6), %s229_s30, 512  }
  0x8d   : > { %784 = vsyncadd (%p1153_p6), %s229_s30, 4294966784  ;;  %s237_s0 = sand.u32 1, %s871_s19   ;;  %s519_s29 = sshll.u32 %s1051_s2, 4 }
  0x8e   : > { %s238_s7 = scalar_lea.sflag [#allocation6], %s237_s0  ;;  %s1063_s12 = scalar_lea.vmem [#allocation5], %s519_s29 }
  0x8f   : > { %786 = dma.done.wait (%p1153_p6), %s238_s7, 256  }
  0x90   : > { %788 = vsyncadd (%p1153_p6), %s238_s7, 4294967040  ;;  %p1154_p7 = scmp.eq.s32.totalorder %s871_s19, 0 }
  0x92   : > { %790 = dma.done.wait (%p1154_p7), [#allocation6], 128   ;;  %p1155_p10 = pmov %p1154_p7 }
  0x93   : > { %p1156_p2 = pmov %p1154_p7 }
  0x94   : > { %792 = vsyncadd (%p1155_p10), [#allocation6], 4294967168 }
  0x95   : > { %794 = dma.done.wait (%p1156_p2), [#allocation9], 256   ;;  %p1157_p0 = pmov %p1156_p2 }
  0x96   : > { %v823_v0 = vmov 0.0   ;;  %v281_v1 = vld [vmem:[%s232_s6 + $0x8] sm:$0xff]  ;;  %v283_v2 = vld [vmem:[%s232_s6 + $0x18] sm:$0xff]  ;;  %v280_v3 = vld [vmem:[%s232_s6] sm:$0xff]  ;;  %vm286_vm0 = vcmask 130048   ;;  %s533_s26 = sshll.u32 %s871_s19, 8 }
  0x97   : > { %796 = vsyncadd (%p1157_p0), [#allocation9], 4294967040  ;;  %354 = vmatprep.mubr.f32.mxu0 %v823_v0  ;;  %v534_v4 = vpack.c.bf16 %v283_v2, %v281_v1  ;;  %v282_v5 = vld [vmem:[%s232_s6 + $0x10] sm:$0xff]  ;;  %v279_v7 = vld [vmem:[#allocation7] sm:$0xff]  ;;  %s278_s9 = scalar_lea.vmem [#allocation10], %s519_s29  ;;  %s1085_s22 = scalar_lea.hbm %s1133_s4, %s533_s26 }
  0x98   : > { %v536_v6 = vpack.c.bf16 %v282_v5, %v280_v3  ;;  %v284_v8 = vld [vmem:[#allocation8] sm:$0xff]  ;;  %v285_v9 = vld [vmem:[#allocation8 + $0x8] sm:$0xff]  ;;  %s394_s8 = sshll.u32 %s278_s9, 4  ;;  %s380_s19 = scalar_lea.sflag [#allocation4], %s1051_s2  ;;  %s1087_s8 = int_to_ptr.vmem [resolvable:$true] %s394_s8 }
  0x99   : > { %535 = vmatprep.subr.bf16.mxu0 %v534_v4  ;;  %v373_v20 = vld [vmem:[%s1063_s12] sm:$0xff]  ;;  %v374_v21 = vld [vmem:[%s1063_s12 + $0x8] sm:$0xff]  ;;  %s737_s5 = scalar_lea.vmem %s1087_s8, 256  ;;  %p1158_p11 = scmp.ne.s32.totalorder %s1143_s27, 0 }
  0x9a   : > { %537 = vmatpush1.bf16.msra.mxu0 %v536_v6  ;;  %p738_p9 = scmp.ne.s32.totalorder %s1087_s8, %s737_s5  ;;  %s824_s20 = smov [#allocation10]  }
  0x9b   : > { %s741_s23 = sshll.u32 %s824_s20, 4  ;;  %s742_s23 = int_to_ptr.vmem [resolvable:$false] %s741_s23 }
  0x9c   : > { %p739_p13 = pnand %p738_p9, %p1158_p11  ;;  %s743_s25 = scalar_lea.vmem %s742_s23, 512 }
  0x9d   : > { %523 = vmatmul.mubr.msk.f32.vlgmr.msra.gmra.mrb[0].mxu0 %vm286_vm0, %v279_v7  ;;  %p744_p12 = scmp.lt.s32.totalorder %s1087_s8, %s742_s23  ;;  %p745_p3 = scmp.lt.s32.totalorder %s743_s25, %s737_s5 }
  0x9e   : > { %p740_p1 = pneg %p739_p13 }
  0x9f   : > { %p746_p4 = por %p745_p3, %p744_p12 }
  0xa1   : > { %p747_p5 = pnand %p746_p4, %p740_p1 }
 0x170   : > { %v356_v10 = vpop.f32.mrb[0].mxu0 }
 0x171   : > { %v357_v11 = vadd.f32 %v356_v10, %v284_v8  ;;  %v358_v12 = vpop.f32.mrb[1].mxu0 }
 0x172   : > { %v359_v13 = vadd.f32 %v358_v12, %v285_v9 }
 0x173   : > { %v524_v14 = vmul.f32 -1.442695, %v357_v11 }
 0x174   : > { %v525_v15 = vmul.f32 -1.442695, %v359_v13 }
 0x175   : > { %613 = vpow2.f32 %v524_v14 }
 0x176   : > { %615 = vpow2.f32 %v525_v15 }
 0x17f   : > { %v614_v16 = vpop.eup %613 }
 0x180   : > { %v616_v17 = vpop.eup %615  ;;  %v367_v18 = vadd.f32 1.0, %v614_v16 }
 0x181   : > { %v368_v19 = vadd.f32 1.0, %v616_v17 }
 0x182   : > { %617 = vrcp.f32 %v367_v18 }
 0x183   : > { %619 = vrcp.f32 %v368_v19 }
 0x18c   : > { %v618_v22 = vpop.eup %617 }
 0x18d   : > { %v620_v23 = vpop.eup %619  ;;  %v375_v24 = vmul.f32 %v618_v22, %v373_v20 }
 0x18e   : > { %v376_v25 = vmul.f32 %v620_v23, %v374_v21 }
 0x18f   : > { %377 = vst [vmem:[%s278_s9] sm:$0xff] %v375_v24 }
 0x190   : > { %378 = vst [vmem:[%s278_s9 + $0x8] sm:$0xff] %v376_v25 }
 0x191   : > { %750 = shalt.err (!%p747_p5)
}
 0x192   : > { %s751_s10 = scalar_lea.hbm %s1085_s22, 256  ;;  %s755_s30 = scalar_lea.hbm %s1133_s4, 512 }
 0x193   : > { %p752_p8 = scmp.ne.s32.totalorder %s1085_s22, %s751_s10  ;;  %p756_p10 = scmp.lt.u32.totalorder %s1085_s22, %s1133_s4 }
 0x194   : > { %p757_p2 = scmp.lt.u32.totalorder %s755_s30, %s751_s10  ;;  %p759_p9 = scmp.lt.u32.totalorder %s751_s10, %s1085_s22 }
 0x195   : > { %p753_p6 = pnand %p752_p8, %p1158_p11 }
 0x196   : > { %p758_p0 = por %p757_p2, %p756_p10 }
 0x197   : > { %p754_p7 = pneg %p753_p6 }
 0x198   : > { %p760_p13 = por %p759_p9, %p758_p0 }
 0x19a   : > { %p761_p1 = pnand %p760_p13, %p754_p7 }
 0x19c   : > { %764 = shalt.err (!%p761_p1)
}
 0x19d   : > { %550 = dma.vmem_to_hbm [thread:$0]  (%p1158_p11), %s1087_s8, 256, %s1085_s22, %s380_s19  }
 0x19e PF: > { %s406_s29 = sand.u32 1, %s803_s15   ;;  %p1159_p12 = scmp.ne.s32.totalorder %s1144_s28, 0 }
 0x19f   : > { %p1160_p3 = scmp.ge.s32.totalorder %s815_s18, 2  ;;  %s407_s7 = scalar_lea.sflag [#allocation4], %s406_s29 }
 0x1a1   : > { %p567_p4 = pnand %p1160_p3, %p1159_p12 }
 0x1a3   : > { %798 = dma.done.wait (!%p567_p4), %s407_s7, 256  }
 0x1a4   : > { %800 = vsyncadd (!%p567_p4), %s407_s7, 4294967040  ;;  %p21_p5 = scmp.ge.s32.totalorder %s875_s21, 4   ;;  %s1161_s15 = smov %s807_s16 }
 0x1a5   : > { %s1162_s16 = smov %s811_s17  ;;  %s1163_s17 = smov %s887_s24 }
 0x1a6   : > { %s1164_s18 = smov %s875_s21  ;;  %23 = sbr.rel (!%p21_p5) target bundleno = 11 (0xb), region = 102 }
 0x1ad   :  { %412 = vsyncpa [#allocation3], 1 }
 0x1ae   :  { %414 = vsyncpa [#allocation3 + $0x1], 1 }
 0x1af   :  { %415 = vsyncpa [#allocation6], 1 }
 0x1b0   :  { %417 = vsyncpa [#allocation6 + $0x1], 1 }
 0x1b1   :  { %418 = vsyncpa [#allocation9], 1 }
 0x1b2   :  { %419 = vsyncpa [#allocation4], 1 }
 0x1b3   :  { %421 = vsyncpa [#allocation4 + $0x1], 1 }

</bundles_post_ra>
